<compile_context>
chip_gen: v6e
topology: v6e:2x2x1
jax: 0.10.0
libtpu: 0.0.40
codegen_flags: <defaults>
</compile_context>

<pallas_src>
import functools

import jax
import jax.numpy as jnp
from jax.experimental import pallas as pl
from jax.experimental.pallas import tpu as pltpu

LANE = 128


def _round_up(x, m):
    return (x + m - 1) // m * m


def _compiler_params(**kwargs):
    """CompilerParams if available on this jax version, else None (use defaults)."""
    try:
        return pltpu.CompilerParams(**kwargs)
    except Exception:
        return None


def _tile_config():
    """Per-generation (tm, tn, tk) tiles + scoped VMEM limit.

    v5e / v6e: 128 MiB physical VMEM -> 1024-class tiles, ~96 MiB scoped limit.
    v7x:        64 MiB physical VMEM -> 512-class tiles,  ~48 MiB scoped limit.
    (tm_cfg == tk_cfg so the node axis uses one consistent tile in every role.)
    """
    try:
        vmem = pltpu.get_tpu_info().vmem_capacity_bytes
    except Exception:
        vmem = 64 * 1024 * 1024
    if vmem > 96 * 1024 * 1024:                       # v5e / v6e
        return (1024, 512, 1024), 96 * 1024 * 1024
    return (512, 512, 512), 48 * 1024 * 1024          # v7x (and unknown -> conservative)


def _pad2d(x, rows, cols, dtype):
    """Zero-pad/cast to (rows, cols) dtype; no-op copy avoided when already aligned."""
    if x.shape == (rows, cols):
        return x if x.dtype == dtype else x.astype(dtype)
    out = jnp.zeros((rows, cols), dtype)
    return out.at[:x.shape[0], :x.shape[1]].set(x.astype(dtype))


# ---------------------------------------------------------------------------
# Tiled  O = maybe_relu(A @ B [+ bias])  kernels (large-graph / generic path)
# ---------------------------------------------------------------------------
def _mm_kernel_multik(*refs, apply_bias, apply_relu):
    """Grid (i, j, k): K innermost, f32 VMEM accumulator, epilogue on last k."""
    if apply_bias:
        a_ref, b_ref, bias_ref, o_ref, acc_ref = refs
    else:
        a_ref, b_ref, o_ref, acc_ref = refs
        bias_ref = None

    k = pl.program_id(2)

    @pl.when(k == 0)
    def _():
        acc_ref[...] = jnp.zeros_like(acc_ref)

    acc_ref[...] += jnp.dot(a_ref[...], b_ref[...],
                            preferred_element_type=jnp.float32)

    @pl.when(k == pl.num_programs(2) - 1)
    def _():
        out = acc_ref[...]
        if apply_bias:
            out = out + bias_ref[...]
        if apply_relu:
            out = jnp.maximum(out, 0.0)
        o_ref[...] = out.astype(o_ref.dtype)


def _mm_kernel_singlek(*refs, apply_bias, apply_relu):
    """Single K block: no accumulator scratch, no pl.when — write o_ref directly."""
    if apply_bias:
        a_ref, b_ref, bias_ref, o_ref = refs
    else:
        a_ref, b_ref, o_ref = refs
        bias_ref = None
    out = jnp.dot(a_ref[...], b_ref[...], preferred_element_type=jnp.float32)
    if apply_bias:
        out = out + bias_ref[...]
    if apply_relu:
        out = jnp.maximum(out, 0.0)
    o_ref[...] = out.astype(o_ref.dtype)


def _matmul_padded(a, b, bias=None, *, apply_relu, out_dtype, tiles, vmem_limit=None):
    """a: [Mp, Kp] bf16, b: [Kp, Np] bf16, bias: [1, Np] f32 or None.

    Shapes must already be exact multiples of the tiles (no re-padding, no slicing:
    padded intermediates can be chained directly between layers).
    """
    Mp, Kp = a.shape
    Kp2, Np = b.shape
    assert Kp == Kp2
    tm, tn, tk = tiles
    assert Mp % tm == 0 and Np % tn == 0 and Kp % tk == 0
    apply_bias = bias is not None
    nk = Kp // tk

    operands = [a, b]
    if nk == 1:
        in_specs = [pl.BlockSpec((tm, tk), lambda i, j: (i, 0)),
                    pl.BlockSpec((tk, tn), lambda i, j: (0, j))]
        if apply_bias:
            operands.append(bias)
            in_specs.append(pl.BlockSpec((1, tn), lambda i, j: (0, j)))
        kernel = functools.partial(_mm_kernel_singlek,
                                   apply_bias=apply_bias, apply_relu=apply_relu)
        return pl.pallas_call(
            kernel,
            out_shape=jax.ShapeDtypeStruct((Mp, Np), out_dtype),
            grid=(Mp // tm, Np // tn),
            in_specs=in_specs,
            out_specs=pl.BlockSpec((tm, tn), lambda i, j: (i, j)),
            compiler_params=_compiler_params(
                dimension_semantics=("parallel", "parallel"),
                vmem_limit_bytes=vmem_limit),
        )(*operands)

    in_specs = [pl.BlockSpec((tm, tk), lambda i, j, k: (i, k)),
                pl.BlockSpec((tk, tn), lambda i, j, k: (k, j))]
    if apply_bias:
        operands.append(bias)
        # bias indexed only by j -> stays resident across i and k iterations
        in_specs.append(pl.BlockSpec((1, tn), lambda i, j, k: (0, j)))
    kernel = functools.partial(_mm_kernel_multik,
                               apply_bias=apply_bias, apply_relu=apply_relu)
    return pl.pallas_call(
        kernel,
        out_shape=jax.ShapeDtypeStruct((Mp, Np), out_dtype),
        grid=(Mp // tm, Np // tn, nk),
        in_specs=in_specs,
        out_specs=pl.BlockSpec((tm, tn), lambda i, j, k: (i, j)),
        scratch_shapes=[pltpu.VMEM((tm, tn), jnp.float32)],
        compiler_params=_compiler_params(
            dimension_semantics=("parallel", "parallel", "arbitrary"),
            vmem_limit_bytes=vmem_limit),
    )(*operands)


def matmul_bias_act(a, b, bias=None, *, apply_relu=False, tiles=None,
                    out_dtype=jnp.float32):
    """Generic wrapper: a [M,K], b [K,N], bias [N] or None -> [M,N]. bf16 in, f32 acc."""
    M, K = a.shape
    K2, N = b.shape
    assert K == K2
    if tiles is None:
        (tm, tn, tk), vmem_limit = _tile_config()
    else:
        tm, tn, tk = tiles
        _, vmem_limit = _tile_config()

    tm = min(tm, _round_up(M, 16))
    tn = min(tn, _round_up(N, LANE))
    tk = min(tk, _round_up(K, LANE))
    Mp, Kp, Np = _round_up(M, tm), _round_up(K, tk), _round_up(N, tn)

    # v7x megacore: make sure the parallel axes have >=2 blocks when M is big enough.
    if Mp // tm == 1 and Np // tn == 1 and Mp >= 512 and (Mp // 2) % 16 == 0:
        tm = Mp // 2

    a_p = _pad2d(a, Mp, Kp, jnp.bfloat16)
    b_p = _pad2d(b, Kp, Np, jnp.bfloat16)
    bias_p = None
    if bias is not None:
        bias_p = _pad2d(bias.reshape(1, -1), 1, Np, jnp.float32)

    out = _matmul_padded(a_p, b_p, bias_p, apply_relu=apply_relu,
                         out_dtype=out_dtype, tiles=(tm, tn, tk),
                         vmem_limit=vmem_limit)
    if out.shape == (M, N):
        return out
    return out[:M, :N]


# ---------------------------------------------------------------------------
# Fused GCN forward: whole model in one pallas_call (everything resident in VMEM)
# ---------------------------------------------------------------------------
def _fused_gcn_kernel(*refs, n_enc, n_dec):
    a_ref, h_ref = refs[0], refs[1]
    enc_refs = refs[2:2 + 2 * n_enc]
    dec_refs = refs[2 + 2 * n_enc:2 + 2 * n_enc + 2 * n_dec]
    henc_ref, dec_ref = refs[-2], refs[-1]

    a_hat = a_ref[...]                                   # bf16 [Np, Np]
    h = h_ref[...]                                       # bf16 [Np, P] (carried in bf16)

    # encoder: relu(A_hat @ (H @ W) + b); XW never leaves vregs/VMEM
    for i in range(n_enc):
        w = enc_refs[2 * i][...]                         # bf16 [P, P]
        b = enc_refs[2 * i + 1][...]                     # f32  [1, P]
        xw = jnp.dot(h, w, preferred_element_type=jnp.float32)
        hf = jnp.maximum(
            jnp.dot(a_hat, xw.astype(jnp.bfloat16),
                    preferred_element_type=jnp.float32) + b, 0.0)
        if i == n_enc - 1:
            henc_ref[...] = hf                           # f32 encoder output
        h = hf.astype(jnp.bfloat16)                      # bf16 loop carry

    # merged lane-dense decoders: dec2 occupies lanes [0, P), dec3 lanes [P, 2P)
    x = h
    for i in range(n_dec):
        w = dec_refs[2 * i][...]
        b = dec_refs[2 * i + 1][...]
        xf = jnp.maximum(jnp.dot(x, w, preferred_element_type=jnp.float32) + b, 0.0)
        if i == n_dec - 1:
            dec_ref[...] = xf
        else:
            x = xf.astype(jnp.bfloat16)


def _fused_dims(params, H):
    N = H.shape[0]
    dims = [H.shape[1]]
    for name in ("enc", "dec2", "dec3"):
        for (W, _) in params[name]:
            dims += [W.shape[0], W.shape[1]]
    P = _round_up(max(dims + [LANE]), LANE)      # lane-dense padded feature width
    Np = _round_up(N, 16)                        # bf16 sublane-aligned node count
    return Np, P


def gcn_forward(params, A_hat, H):
    """Entire GCN forward (encoder + both decoders) in ONE pallas_call."""
    N = H.shape[0]
    n_enc = len(params["enc"])
    n_dec = len(params["dec2"])
    assert len(params["dec3"]) == n_dec

    Np, P = _fused_dims(params, H)
    _, vmem_limit = _tile_config()

    a_hat_p = _pad2d(A_hat, Np, Np, jnp.bfloat16)
    h0 = _pad2d(H, Np, P, jnp.bfloat16)

    enc_args = []
    for (W, b) in params["enc"]:
        enc_args.append(_pad2d(W, P, P, jnp.bfloat16))
        enc_args.append(_pad2d(b.reshape(1, -1), 1, P, jnp.float32))

    # Merge the two decoders along the output dim (block-diagonal weights) so every
    # decoder matmul writes a 2*P-lane, unmasked output instead of 4-8 lanes each.
    dec_args = []
    for i in range(n_dec):
        W2, b2 = params["dec2"][i]
        W3, b3 = params["dec3"][i]
        din = P if i == 0 else 2 * P
        r3 = 0 if i == 0 else P
        Wm = jnp.zeros((din, 2 * P), jnp.bfloat16)
        Wm = Wm.at[:W2.shape[0], :W2.shape[1]].set(W2.astype(jnp.bfloat16))
        Wm = Wm.at[r3:r3 + W3.shape[0], P:P + W3.shape[1]].set(W3.astype(jnp.bfloat16))
        bm = jnp.zeros((1, 2 * P), jnp.float32)
        bm = bm.at[0, :b2.shape[0]].set(b2.astype(jnp.float32))
        bm = bm.at[0, P:P + b3.shape[0]].set(b3.astype(jnp.float32))
        dec_args.append(Wm)
        dec_args.append(bm)

    operands = [a_hat_p, h0] + enc_args + dec_args
    out_shape = (jax.ShapeDtypeStruct((Np, P), jnp.float32),
                 jax.ShapeDtypeStruct((Np, 2 * P), jnp.float32))

    kernel = functools.partial(_fused_gcn_kernel, n_enc=n_enc, n_dec=n_dec)
    # No grid / no BlockSpecs: every operand & output gets a single full-array VMEM
    # placement (no double-buffering tax for a one-shot kernel).
    henc, dec = pl.pallas_call(
        kernel,
        out_shape=out_shape,
        compiler_params=_compiler_params(vmem_limit_bytes=vmem_limit),
    )(*operands)

    enc_out = params["enc"][-1][0].shape[1]
    dec2_out = params["dec2"][-1][0].shape[1]
    dec3_out = params["dec3"][-1][0].shape[1]
    H_enc = henc[:N, :enc_out]
    d2 = dec[:N, :dec2_out]
    d3 = dec[:N, P:P + dec3_out]
    return H_enc, H_enc, d2, d3


def gcn_forward_tiled(params, A_hat, H):
    """Layer-by-layer path for graphs whose dense A_hat no longer fits in VMEM.

    A_hat is cast/padded to bf16 ONCE and reused by every encoder layer; intermediate
    activations stay padded & bf16 between layers (no slice / re-pad / re-cast per
    layer), only the final outputs are sliced back to logical shapes.
    """
    # TODO(synk): for very large graphs, replace the dense A_hat stream with a
    # block-sparse propagation (scalar-prefetched block mask / block-CSR).
    M = H.shape[0]
    (tm_cfg, tn_cfg, tk_cfg), vmem_limit = _tile_config()

    # One node-axis tile used for BOTH its M-role and K-role (keeps padding consistent).
    t_node = min(tm_cfg, tk_cfg, _round_up(M, 256))
    Mp = _round_up(M, t_node)
    if Mp // t_node == 1 and Mp >= 512:
        t_node = Mp // 2          # >=2 M blocks so both v7x TensorCores get work
        # (Mp is a multiple of 256 -> Mp//2 is a multiple of 128: legal tile)

    def feat_pad(F):
        return _round_up(F, LANE)

    def feat_tile(Fp, cfg):
        t = min(cfg, Fp)
        t -= t % LANE
        while Fp % t:
            t -= LANE
        return t

    # Cast/pad the big operands ONCE.
    A_p = _pad2d(A_hat, Mp, Mp, jnp.bfloat16)
    H_p = _pad2d(H, Mp, feat_pad(H.shape[1]), jnp.bfloat16)

    n_enc = len(params["enc"])
    H_enc_p = None
    for li, (W, b) in enumerate(params["enc"]):
        Fin, Fout = W.shape
        Fin_p, Fout_p = feat_pad(Fin), feat_pad(Fout)
        W_p = _pad2d(W, Fin_p, Fout_p, jnp.bfloat16)
        b_p = _pad2d(b.reshape(1, -1), 1, Fout_p, jnp.float32)
        tn = feat_tile(Fout_p, tn_cfg)
        tk = feat_tile(Fin_p, tk_cfg)
        last = li == n_enc - 1

        # XW = H @ W  (bf16 chained intermediate, stays padded)
        XW = _matmul_padded(H_p, W_p, None, apply_relu=False,
                            out_dtype=jnp.bfloat16, tiles=(t_node, tn, tk),
                            vmem_limit=vmem_limit)
        # H = relu(A_hat @ XW + b); last layer kept in f32 (it is a model output)
        H_new = _matmul_padded(A_p, XW, b_p, apply_relu=True,
                               out_dtype=jnp.float32 if last else jnp.bfloat16,
                               tiles=(t_node, tn, t_node),
                               vmem_limit=vmem_limit)
        if last:
            H_enc_p = H_new
            H_p = H_new.astype(jnp.bfloat16)
        else:
            H_p = H_new

    enc_out = params["enc"][-1][0].shape[1]
    H_enc = H_enc_p[:M, :enc_out]

    def decoder(x_p, layers):
        n = len(layers)
        out_dim = layers[-1][0].shape[1]
        for li, (W, b) in enumerate(layers):
            Fin, Fout = W.shape
            Fin_p, Fout_p = feat_pad(Fin), feat_pad(Fout)
            W_p = _pad2d(W, Fin_p, Fout_p, jnp.bfloat16)
            b_p = _pad2d(b.reshape(1, -1), 1, Fout_p, jnp.float32)
            tn = feat_tile(Fout_p, tn_cfg)
            tk = feat_tile(Fin_p, tk_cfg)
            last = li == n - 1
            x_p = _matmul_padded(x_p, W_p, b_p, apply_relu=True,
                                 out_dtype=jnp.float32 if last else jnp.bfloat16,
                                 tiles=(t_node, tn, tk),
                                 vmem_limit=vmem_limit)
        return x_p[:M, :out_dim]

    return H_enc, H_enc, decoder(H_p, params["dec2"]), decoder(H_p, params["dec3"])


def gcn_forward_auto(params, A_hat, H):
    """Generation-aware dispatch: fused single-kernel path if it fits VMEM, else tiled."""
    Np, P = _fused_dims(params, H)
    _, vmem_limit = _tile_config()
    # Resident bytes: A_hat (bf16) + h0 (bf16) + f32 outputs + in-kernel activations.
    est = (2 * Np * Np + 2 * Np * P            # inputs
           + 4 * Np * P + 4 * Np * 2 * P       # outputs
           + 6 * 4 * Np * P)                   # headroom for xw / h intermediates
    if est <= vmem_limit // 2:
        return gcn_forward(params, A_hat, H)
    return gcn_forward_tiled(params, A_hat, H)


# ---------------------------------------------------------------------------
# Pure-JAX reference mirroring the kernels' bf16-in / f32-accumulate numerics
# ---------------------------------------------------------------------------
def gcn_forward_ref(params, A_hat, H):
    bf = lambda x: x.astype(jnp.bfloat16)
    A_b = bf(A_hat)
    h = H.astype(jnp.float32)
    for (W, b) in params["enc"]:
        xw = jnp.dot(bf(h), bf(W), preferred_element_type=jnp.float32)
        h = jnp.maximum(jnp.dot(A_b, bf(xw), preferred_element_type=jnp.float32) + b, 0.0)

    def dec(x, layers):
        for (W, b) in layers:
            x = jnp.maximum(jnp.dot(bf(x), bf(W), preferred_element_type=jnp.float32) + b, 0.0)
        return x

    return h, h, dec(h, params["dec2"]), dec(h, params["dec3"])


# ---------------------------------------------------------------------------
# Glue: dense normalized adjacency + parameter construction
# ---------------------------------------------------------------------------
def build_norm_adj(edge_index, num_nodes):
    src, dst = edge_index[0], edge_index[1]
    A = jnp.zeros((num_nodes, num_nodes), jnp.float32)
    A = A.at[src, dst].add(1.0)
    A = A + jnp.eye(num_nodes, dtype=jnp.float32)           # self loops
    deg = A.sum(axis=1)
    d_inv_sqrt = jnp.where(deg > 0, 1.0 / jnp.sqrt(deg), 0.0)
    return A * d_inv_sqrt[:, None] * d_inv_sqrt[None, :]


def _glorot(key, shape):
    fan_in, fan_out = shape
    limit = jnp.sqrt(6.0 / (fan_in + fan_out))
    return jax.random.uniform(key, shape, jnp.float32, -limit, limit)


def init_gcn_params(key, channel, input_dim, hidden_dim, out_dim,
                    dec2_dim, dec3_dim, enc_layer, dec_layer):
    params = {"enc": [], "dec2": [], "dec3": []}

    enc_dims = []
    for i in range(enc_layer):
        if i == 0:
            enc_dims.append((input_dim, hidden_dim * channel))
        elif i == enc_layer - 1:
            enc_dims.append((hidden_dim * channel, out_dim * channel))
        else:
            enc_dims.append((hidden_dim * channel, hidden_dim * channel))
    for (din, dout) in enc_dims:
        key, k1 = jax.random.split(key)
        params["enc"].append((_glorot(k1, (din, dout)),
                              jnp.zeros((dout,), jnp.float32)))

    def dec_dims(in_dim, hid, out, layer):
        dims = []
        for i in range(layer):
            if layer > 1:
                if i == 0:
                    dims.append((in_dim, hid))
                elif i == layer - 1:
                    dims.append((hid, out))
                else:
                    dims.append((hid, hid))
            else:
                dims.append((in_dim, out))
        return dims

    for name, dims in (("dec2", dec_dims(out_dim * channel, hidden_dim, dec2_dim, dec_layer)),
                       ("dec3", dec_dims(out_dim * channel, hidden_dim, dec3_dim, dec_layer))):
        for (din, dout) in dims:
            key, k1, k2 = jax.random.split(key, 3)
            bound = 1.0 / jnp.sqrt(din)
            W = jax.random.uniform(k1, (din, dout), jnp.float32, -bound, bound)
            b = jax.random.uniform(k2, (dout,), jnp.float32, -bound, bound)
            params[name].append((W, b))
    return params


# ---------------------------------------------------------------------------
if __name__ == "__main__":
    channel = 2
    input_dim = 8
    hidden_dim = 8
    out_dim = 8
    dec2_dim = 4
    dec3_dim = 4
    enc_layer = 2
    dec_layer = 2
    num_nodes = 16

    key = jax.random.PRNGKey(0)
    key, k_h = jax.random.split(key)
    H = jax.random.normal(k_h, (num_nodes, input_dim), jnp.float32)

    # deterministic undirected ring graph: edge_index [2, 2N]
    idx = jnp.arange(num_nodes)
    src = jnp.concatenate([idx, (idx + 1) % num_nodes])
    dst = jnp.concatenate([(idx + 1) % num_nodes, idx])
    edge_index = jnp.stack([src, dst])
    A_hat = build_norm_adj(edge_index, num_nodes)

    params = init_gcn_params(key, channel, input_dim, hidden_dim, out_dim,
                             dec2_dim, dec3_dim, enc_layer, dec_layer)

    # 1) fully fused forward: ONE pallas_call for the whole model
    h1, h2, d2, d3 = gcn_forward(params, A_hat, H)
    jax.block_until_ready((h1, h2, d2, d3))
    assert h1.shape == (num_nodes, out_dim * channel)
    assert d2.shape == (num_nodes, dec2_dim)
    assert d3.shape == (num_nodes, dec3_dim)

    # 1b) VMEM-aware dispatcher (picks the fused path at this size)
    a1, _, ad2, ad3 = gcn_forward_auto(params, A_hat, H)
    jax.block_until_ready((a1, ad2, ad3))

    # 2) tiled fallback path (exercises the gridded kernels end to end)
    t1, _, td2, td3 = gcn_forward_tiled(params, A_hat, H)
    jax.block_until_ready((t1, td2, td3))

    # 3) standalone multi-tile check of the accumulator matmul kernel (grid (2, 2, 2))
    k1, k2, k3 = jax.random.split(jax.random.PRNGKey(1), 3)
    a = jax.random.normal(k1, (256, 512), jnp.float32)
    b = jax.random.normal(k2, (512, 256), jnp.float32)
    bias = jax.random.normal(k3, (256,), jnp.float32)
    y = matmul_bias_act(a, b, bias=bias, apply_relu=True, tiles=(128, 128, 256))
    y_ref = jnp.maximum(
        jnp.dot(a.astype(jnp.bfloat16).astype(jnp.float32),
                b.astype(jnp.bfloat16).astype(jnp.float32),
                precision=jax.lax.Precision.HIGHEST) + bias[None, :], 0.0)
    jax.block_until_ready(y)

    # 4) larger graph: exercises the multi-K accumulator path + megacore M-split
    n_big = 300
    key, k_hb = jax.random.split(key)
    Hb = jax.random.normal(k_hb, (n_big, input_dim), jnp.float32)
    idxb = jnp.arange(n_big)
    srcb = jnp.concatenate([idxb, (idxb + 1) % n_big])
    dstb = jnp.concatenate([(idxb + 1) % n_big, idxb])
    A_hat_b = build_norm_adj(jnp.stack([srcb, dstb]), n_big)
    tb1, _, tbd2, tbd3 = gcn_forward_tiled(params, A_hat_b, Hb)
    jax.block_until_ready((tb1, tbd2, tbd3))

    # numerical cross-checks
    r1, _, rd2, rd3 = gcn_forward_ref(params, A_hat, H)
    rb1, _, rbd2, rbd3 = gcn_forward_ref(params, A_hat_b, Hb)
    ok = True
    ok &= bool(jnp.allclose(h1, t1, rtol=2e-3, atol=2e-3))
    ok &= bool(jnp.allclose(d2, td2, rtol=2e-3, atol=2e-3))
    ok &= bool(jnp.allclose(d3, td3, rtol=2e-3, atol=2e-3))
    ok &= bool(jnp.allclose(h1, a1, rtol=2e-3, atol=2e-3))
    ok &= bool(jnp.allclose(h1, r1, rtol=1e-2, atol=1e-2))
    ok &= bool(jnp.allclose(d2, rd2, rtol=1e-2, atol=1e-2))
    ok &= bool(jnp.allclose(d3, rd3, rtol=1e-2, atol=1e-2))
    ok &= bool(jnp.allclose(tb1, rb1, rtol=1e-2, atol=1e-2))
    ok &= bool(jnp.allclose(tbd2, rbd2, rtol=1e-2, atol=1e-2))
    ok &= bool(jnp.allclose(tbd3, rbd3, rtol=1e-2, atol=1e-2))
    ok &= bool(jnp.allclose(y, y_ref, rtol=1e-2, atol=1e-2))
    assert ok, "numerical mismatch vs reference"

    print("KERNEL_OK")
</pallas_src>

<mosaic_0001>
module attributes {stable_mosaic.version = 11 : i64} {
  func.func @_fused_gcn_kernel(%arg0: memref<16x16xbf16, #tpu.memory_space<vmem>>, %arg1: memref<16x128xbf16, #tpu.memory_space<vmem>>, %arg2: memref<128x128xbf16, #tpu.memory_space<vmem>>, %arg3: memref<1x128xf32, #tpu.memory_space<vmem>>, %arg4: memref<128x128xbf16, #tpu.memory_space<vmem>>, %arg5: memref<1x128xf32, #tpu.memory_space<vmem>>, %arg6: memref<128x256xbf16, #tpu.memory_space<vmem>>, %arg7: memref<1x256xf32, #tpu.memory_space<vmem>>, %arg8: memref<256x256xbf16, #tpu.memory_space<vmem>>, %arg9: memref<1x256xf32, #tpu.memory_space<vmem>>, %arg10: memref<16x128xf32, #tpu.memory_space<vmem>>, %arg11: memref<16x256xf32, #tpu.memory_space<vmem>>) attributes {dimension_semantics = [], scalar_prefetch = 0 : i64, scratch_operands = 0 : i64, tpu.core_type = #tpu.core_type<tc>} {
    %c0 = arith.constant 0 : index
    %c0_0 = arith.constant 0 : index
    %0 = vector.load %arg0[%c0, %c0_0] : memref<16x16xbf16, #tpu.memory_space<vmem>>, vector<16x16xbf16>
    %c0_1 = arith.constant 0 : index
    %c0_2 = arith.constant 0 : index
    %1 = vector.load %arg1[%c0_1, %c0_2] : memref<16x128xbf16, #tpu.memory_space<vmem>>, vector<16x128xbf16>
    %c0_3 = arith.constant 0 : index
    %c0_4 = arith.constant 0 : index
    %2 = vector.load %arg2[%c0_3, %c0_4] : memref<128x128xbf16, #tpu.memory_space<vmem>>, vector<128x128xbf16>
    %c0_5 = arith.constant 0 : index
    %c0_6 = arith.constant 0 : index
    %3 = vector.load %arg3[%c0_5, %c0_6] : memref<1x128xf32, #tpu.memory_space<vmem>>, vector<1x128xf32>
    %cst = arith.constant dense<0.000000e+00> : vector<16x128xf32>
    %4 = tpu.matmul %1, %2, %cst {dimension_numbers = #tpu.dot_dimension_numbers<[1], [0], [0], [1], [0, 0, 1, 1], [], []>} : vector<16x128xbf16>, vector<128x128xbf16>, vector<16x128xf32> -> vector<16x128xf32>
    %5 = arith.truncf %4 : vector<16x128xf32> to vector<16x128xbf16>
    %cst_7 = arith.constant dense<0.000000e+00> : vector<16x128xf32>
    %6 = tpu.matmul %0, %5, %cst_7 {dimension_numbers = #tpu.dot_dimension_numbers<[1], [0], [0], [1], [0, 0, 1, 1], [], []>} : vector<16x16xbf16>, vector<16x128xbf16>, vector<16x128xf32> -> vector<16x128xf32>
    %7 = vector.broadcast %3 : vector<1x128xf32> to vector<16x128xf32>
    %8 = arith.addf %6, %7 : vector<16x128xf32>
    %cst_8 = arith.constant 0.000000e+00 : f32
    %9 = vector.broadcast %cst_8 : f32 to vector<16x128xf32>
    %10 = arith.maximumf %8, %9 : vector<16x128xf32>
    %11 = arith.truncf %10 : vector<16x128xf32> to vector<16x128xbf16>
    %c0_9 = arith.constant 0 : index
    %c0_10 = arith.constant 0 : index
    %12 = vector.load %arg4[%c0_9, %c0_10] : memref<128x128xbf16, #tpu.memory_space<vmem>>, vector<128x128xbf16>
    %c0_11 = arith.constant 0 : index
    %c0_12 = arith.constant 0 : index
    %13 = vector.load %arg5[%c0_11, %c0_12] : memref<1x128xf32, #tpu.memory_space<vmem>>, vector<1x128xf32>
    %cst_13 = arith.constant dense<0.000000e+00> : vector<16x128xf32>
    %14 = tpu.matmul %11, %12, %cst_13 {dimension_numbers = #tpu.dot_dimension_numbers<[1], [0], [0], [1], [0, 0, 1, 1], [], []>} : vector<16x128xbf16>, vector<128x128xbf16>, vector<16x128xf32> -> vector<16x128xf32>
    %15 = arith.truncf %14 : vector<16x128xf32> to vector<16x128xbf16>
    %cst_14 = arith.constant dense<0.000000e+00> : vector<16x128xf32>
    %16 = tpu.matmul %0, %15, %cst_14 {dimension_numbers = #tpu.dot_dimension_numbers<[1], [0], [0], [1], [0, 0, 1, 1], [], []>} : vector<16x16xbf16>, vector<16x128xbf16>, vector<16x128xf32> -> vector<16x128xf32>
    %17 = vector.broadcast %13 : vector<1x128xf32> to vector<16x128xf32>
    %18 = arith.addf %16, %17 : vector<16x128xf32>
    %cst_15 = arith.constant 0.000000e+00 : f32
    %19 = vector.broadcast %cst_15 : f32 to vector<16x128xf32>
    %20 = arith.maximumf %18, %19 : vector<16x128xf32>
    %c0_16 = arith.constant 0 : index
    %c0_17 = arith.constant 0 : index
    %21 = vector.load %arg10[%c0_16, %c0_17] : memref<16x128xf32, #tpu.memory_space<vmem>>, vector<16x128xf32>
    tpu.vector_store %arg10[%c0_16, %c0_17], %20 {strides = array<i32>} : memref<16x128xf32, #tpu.memory_space<vmem>>, vector<16x128xf32>,
    %22 = arith.truncf %20 : vector<16x128xf32> to vector<16x128xbf16>
    %c0_18 = arith.constant 0 : index
    %c0_19 = arith.constant 0 : index
    %23 = vector.load %arg6[%c0_18, %c0_19] : memref<128x256xbf16, #tpu.memory_space<vmem>>, vector<128x256xbf16>
    %c0_20 = arith.constant 0 : index
    %c0_21 = arith.constant 0 : index
    %24 = vector.load %arg7[%c0_20, %c0_21] : memref<1x256xf32, #tpu.memory_space<vmem>>, vector<1x256xf32>
    %cst_22 = arith.constant dense<0.000000e+00> : vector<16x256xf32>
    %25 = tpu.matmul %22, %23, %cst_22 {dimension_numbers = #tpu.dot_dimension_numbers<[1], [0], [0], [1], [0, 0, 1, 1], [], []>} : vector<16x128xbf16>, vector<128x256xbf16>, vector<16x256xf32> -> vector<16x256xf32>
    %26 = vector.broadcast %24 : vector<1x256xf32> to vector<16x256xf32>
    %27 = arith.addf %25, %26 : vector<16x256xf32>
    %cst_23 = arith.constant 0.000000e+00 : f32
    %28 = vector.broadcast %cst_23 : f32 to vector<16x256xf32>
    %29 = arith.maximumf %27, %28 : vector<16x256xf32>
    %30 = arith.truncf %29 : vector<16x256xf32> to vector<16x256xbf16>
    %c0_24 = arith.constant 0 : index
    %c0_25 = arith.constant 0 : index
    %31 = vector.load %arg8[%c0_24, %c0_25] : memref<256x256xbf16, #tpu.memory_space<vmem>>, vector<256x256xbf16>
    %c0_26 = arith.constant 0 : index
    %c0_27 = arith.constant 0 : index
    %32 = vector.load %arg9[%c0_26, %c0_27] : memref<1x256xf32, #tpu.memory_space<vmem>>, vector<1x256xf32>
    %cst_28 = arith.constant dense<0.000000e+00> : vector<16x256xf32>
    %33 = tpu.matmul %30, %31, %cst_28 {dimension_numbers = #tpu.dot_dimension_numbers<[1], [0], [0], [1], [0, 0, 1, 1], [], []>} : vector<16x256xbf16>, vector<256x256xbf16>, vector<16x256xf32> -> vector<16x256xf32>
    %34 = vector.broadcast %32 : vector<1x256xf32> to vector<16x256xf32>
    %35 = arith.addf %33, %34 : vector<16x256xf32>
    %cst_29 = arith.constant 0.000000e+00 : f32
    %36 = vector.broadcast %cst_29 : f32 to vector<16x256xf32>
    %37 = arith.maximumf %35, %36 : vector<16x256xf32>
    %c0_30 = arith.constant 0 : index
    %c0_31 = arith.constant 0 : index
    %38 = vector.load %arg11[%c0_30, %c0_31] : memref<16x256xf32, #tpu.memory_space<vmem>>, vector<16x256xf32>
    tpu.vector_store %arg11[%c0_30, %c0_31], %37 {strides = array<i32>} : memref<16x256xf32, #tpu.memory_space<vmem>>, vector<16x256xf32>,
    return
  }
}

</mosaic_0001>

<bundles_post_ra>
// kernel: tpu_custom_call.1
= control target key start
LH: loop header
LB: loop body
LE: loop exit
PB: predicated region body
PF: predicated region fallthrough
CT: control target
= control target key end

     0   :  { %17 = vsyncpa [#allocation3], 0  ;;  %s1490_s0 = inlined_call_operand.hbm [shape: bf16[16,16], index: 0, kind: input, shape index: {}]   ;;  %s1491_s1 = inlined_call_operand.hbm [shape: bf16[16,128], index: 1, kind: input, shape index: {}]   ;;  %s1492_s2 = inlined_call_operand.hbm [shape: bf16[128,128], index: 2, kind: input, shape index: {}]   ;;  %s1493_s3 = inlined_call_operand.vmem [shape: f32[1,128], index: 3, kind: input, shape index: {}]   ;;  %s1494_s4 = inlined_call_operand.hbm [shape: bf16[128,128], index: 4, kind: input, shape index: {}]   ;;  %s1495_s5 = inlined_call_operand.vmem [shape: f32[1,128], index: 5, kind: input, shape index: {}]   ;;  %s1496_s6 = inlined_call_operand.hbm [shape: bf16[128,256], index: 6, kind: input, shape index: {}]   ;;  %s1497_s7 = inlined_call_operand.vmem [shape: f32[1,256], index: 7, kind: input, shape index: {}]   ;;  %s1498_s8 = inlined_call_operand.hbm [shape: bf16[256,256], index: 8, kind: input, shape index: {}]   ;;  %s1499_s9 = inlined_call_operand.vmem [shape: f32[1,256], index: 9, kind: input, shape index: {}]   ;;  %s1500_s10 = inlined_call_operand.hbm [shape: f32[16,128], index: 10, kind: output, shape index: {0}]   ;;  %s1501_s11 = inlined_call_operand.hbm [shape: f32[16,256], index: 11, kind: output, shape index: {1}]  }
   0x1   :  { %18 = vsyncpa [#allocation6], 0 }
   0x2   :  { %19 = vsyncpa [#allocation9], 0 }
   0x3   :  { %20 = vsyncpa [#allocation12], 0 }
   0x4   :  { %21 = vsyncpa [#allocation4], 0 }
   0x5   :  { %22 = vsyncpa [#allocation15], 0  ;;  %s1328_s17 = smov [#allocation5]   ;;  %s1329_s19 = smov [#allocation8]  }
   0x6   :  { %s40_s18 = sshll.u32 %s1328_s17, 4  ;;  %s66_s20 = sshll.u32 %s1329_s19, 4  ;;  %s41_s18 = int_to_ptr.vmem [resolvable:$true] %s40_s18  ;;  %s67_s20 = int_to_ptr.vmem [resolvable:$true] %s66_s20 }
   0x7   :  { %s1164_s21 = scalar_lea.vmem %s41_s18, 128  ;;  %p1169_p1 = scmp.lt.s32.totalorder %s41_s18, %s41_s18 }
   0x8   :  { %p1165_p0 = scmp.ne.s32.totalorder %s41_s18, %s1164_s21  ;;  %p1170_p2 = scmp.lt.s32.totalorder %s1164_s21, %s1164_s21 }
   0xa   :  { %p1171_p3 = por %p1170_p2, %p1169_p1 }
   0xc   :  { %p1172_p4 = pnand %p1171_p3, %p1165_p0 }
   0xe   :  { %1175 = shalt.err (!%p1172_p4)
}
   0xf   :  { %s1330_s22 = smov 64   ;;  %s1331_s23 = smov 4  }
  0x10   :  { %46 = dma.hbm_to_vmem [thread:$0]  %s1491_s1, 128, %s41_s18, [#allocation6], %s1330_s22, %s1330_s22, %s1331_s23  }
  0x11   :  { %s1184_s26 = scalar_lea.vmem %s67_s20, 1024  ;;  %p1189_p6 = scmp.lt.s32.totalorder %s67_s20, %s67_s20 }
  0x12   :  { %p1185_p5 = scmp.ne.s32.totalorder %s67_s20, %s1184_s26  ;;  %p1190_p7 = scmp.lt.s32.totalorder %s1184_s26, %s1184_s26 }
  0x14   :  { %p1191_p8 = por %p1190_p7, %p1189_p6 }
  0x16   :  { %p1192_p9 = pnand %p1191_p8, %p1185_p5 }
  0x18   :  { %1195 = shalt.err (!%p1192_p9)
}
  0x19   :  { %72 = dma.hbm_to_vmem [thread:$0]  %s1494_s4, 1024, %s67_s20, [#allocation9], %s1330_s22, %s1330_s22, %s1331_s23  }
  0x1a   :  { %s1332_s29 = smov [#allocation2]   ;;  %s1333_s12 = smov [#allocation7]  }
  0x1b   :  { %s28_s30 = sshll.u32 %s1332_s29, 4  ;;  %s52_s13 = sshll.u32 %s1333_s12, 4  ;;  %s29_s30 = int_to_ptr.vmem [resolvable:$true] %s28_s30  ;;  %s53_s13 = int_to_ptr.vmem [resolvable:$true] %s52_s13 }
  0x1c   :  { %s1204_s1 = scalar_lea.vmem %s29_s30, 128  ;;  %p1209_p11 = scmp.lt.s32.totalorder %s29_s30, %s29_s30 }
  0x1d   :  { %p1205_p10 = scmp.ne.s32.totalorder %s29_s30, %s1204_s1  ;;  %p1210_p12 = scmp.lt.s32.totalorder %s1204_s1, %s1204_s1 }
  0x1f   :  { %p1211_p13 = por %p1210_p12, %p1209_p11 }
  0x21   :  { %p1212_p0 = pnand %p1211_p13, %p1205_p10 }
  0x23   :  { %1215 = shalt.err (!%p1212_p0)
}
  0x24   :  { %34 = dma.hbm_to_vmem [thread:$0]  %s1490_s0, 128, %s29_s30, [#allocation3], %s1330_s22, %s1330_s22, %s1331_s23  }
  0x25   :  { %s1224_s4 = scalar_lea.vmem %s53_s13, 1024  ;;  %p1229_p2 = scmp.lt.s32.totalorder %s53_s13, %s53_s13 }
  0x26   :  { %p1225_p1 = scmp.ne.s32.totalorder %s53_s13, %s1224_s4  ;;  %p1230_p3 = scmp.lt.s32.totalorder %s1224_s4, %s1224_s4 }
  0x28   :  { %p1231_p4 = por %p1230_p3, %p1229_p2 }
  0x2a   :  { %p1232_p5 = pnand %p1231_p4, %p1225_p1 }
  0x2c   :  { %1235 = shalt.err (!%p1232_p5)
}
  0x2d   :  { %58 = dma.hbm_to_vmem [thread:$0]  %s1492_s2, 1024, %s53_s13, [#allocation6], %s1330_s22, %s1330_s22, %s1331_s23  }
  0x2e   :  { %s1334_s18 = smov [#allocation10]  }
  0x2f   :  { %s80_s19 = sshll.u32 %s1334_s18, 4  ;;  %s81_s19 = int_to_ptr.vmem [resolvable:$true] %s80_s19 }
  0x30   :  { %s1244_s20 = scalar_lea.vmem %s81_s19, 2048  ;;  %p1249_p7 = scmp.lt.s32.totalorder %s81_s19, %s81_s19 }
  0x31   :  { %p1245_p6 = scmp.ne.s32.totalorder %s81_s19, %s1244_s20  ;;  %p1250_p8 = scmp.lt.s32.totalorder %s1244_s20, %s1244_s20 }
  0x33   :  { %p1251_p9 = por %p1250_p8, %p1249_p7 }
  0x35   :  { %p1252_p10 = pnand %p1251_p9, %p1245_p6 }
  0x37   :  { %1255 = shalt.err (!%p1252_p10)
}
  0x38   :  { %s1335_s0 = smov 128   ;;  %s1336_s21 = smov 8  }
  0x39   :  { %86 = dma.hbm_to_vmem [thread:$0]  %s1496_s6, 2048, %s81_s19, [#allocation9], %s1335_s0, %s1335_s0, %s1336_s21  }
  0x3a   :  { %s1337_s2 = smov [#allocation11]  }
  0x3b   :  { %s94_s22 = sshll.u32 %s1337_s2, 4  ;;  %s95_s22 = int_to_ptr.vmem [resolvable:$true] %s94_s22 }
  0x3c   :  { %s1264_s23 = scalar_lea.vmem %s95_s22, 4096  ;;  %p1269_p12 = scmp.lt.s32.totalorder %s95_s22, %s95_s22 }
  0x3d   :  { %p1265_p11 = scmp.ne.s32.totalorder %s95_s22, %s1264_s23  ;;  %p1270_p13 = scmp.lt.s32.totalorder %s1264_s23, %s1264_s23 }
  0x3f   :  { %p1271_p0 = por %p1270_p13, %p1269_p12 }
  0x41   :  { %p1272_p1 = pnand %p1271_p0, %p1265_p11 }
  0x43   :  { %1275 = shalt.err (!%p1272_p1)
}
  0x44   :  { %100 = dma.hbm_to_vmem [thread:$0]  %s1498_s8, 4096, %s95_s22, [#allocation12], %s1335_s0, %s1335_s0, %s1336_s21  }
  0x45   :  { %1316 = dma.done.wait [#allocation3], 128  }
  0x46   :  { %1317 = vsyncadd [#allocation3], 4294967168 }
  0x47   :  { %1318 = dma.done.wait [#allocation6], 1152  }
  0x48   :  { %1319 = vsyncadd [#allocation6], 4294966144 }
  0x49   :  { %1320 = dma.done.wait [#allocation9], 3072  }
  0x4a   :  { %1321 = vsyncadd [#allocation9], 4294964224 }
  0x4b   :  { %1322 = dma.done.wait [#allocation12], 4096  }
  0x4c   :  { %1323 = vsyncadd [#allocation12], 4294963200  ;;  %v1338_v0 = vmov 0.0   ;;  %vm1339_vm0 = vmmov 0   ;;  %v1066_v1 = vld [vmem:[#allocation7 + $0x38] sm:$0xff]   ;;  %v1067_v2 = vld [vmem:[#allocation7 + $0x30] sm:$0xff]  }
  0x4d   :  { %997 = vmatprep.subr.bf16.mxu0 %v1338_v0  ;;  %1013 = vmatprep.mubr.msk.bf16.mxu0 %vm1339_vm0, %v1338_v0  ;;  %v1068_v3 = vld [vmem:[#allocation7 + $0x28] sm:$0xff]   ;;  %v1069_v4 = vld [vmem:[#allocation7 + $0x20] sm:$0xff]   ;;  %v1070_v5 = vld [vmem:[#allocation7 + $0x18] sm:$0xff]   ;;  %vm250_vm1 = vcmask 130048   ;;  %v1340_v55 = vmov 0   ;;  %s1341_s30 = smov [#allocation13]  }
  0x4e   :  { %1017 = vmatprep.subr.bf16.mxu1 %v1338_v0  ;;  %1019 = vmatprep.mubr.msk.bf16.mxu1 %vm1339_vm0, %v1338_v0  ;;  %v1071_v6 = vld [vmem:[#allocation7 + $0x10] sm:$0xff]   ;;  %v1072_v7 = vld [vmem:[#allocation7 + $0x8] sm:$0xff]   ;;  %v1073_v8 = vld [vmem:[#allocation7] sm:$0xff]  }
  0x4f   :  { %998 = vmatpush3.bf16.msra.mxu0 %v1066_v1  ;;  %v1074_v9 = vld [vmem:[#allocation5] sm:$0xff]   ;;  %v1075_v15 = vld [vmem:[#allocation2] sm:$0xff]   ;;  %v1078_v18 = vld [vmem:[#allocation8 + $0x28] sm:$0xff]  }
  0x50   :  { %999 = vmatprep.subr.bf16.mxu0 %v1338_v0  ;;  %v1076_v16 = vld [vmem:[#allocation8 + $0x38] sm:$0xff]   ;;  %v1077_v17 = vld [vmem:[#allocation8 + $0x30] sm:$0xff]   ;;  %v1079_v19 = vld [vmem:[#allocation8 + $0x20] sm:$0xff]  }
  0x51   :  { %v1080_v20 = vld [vmem:[#allocation8 + $0x18] sm:$0xff]   ;;  %v1081_v21 = vld [vmem:[#allocation8 + $0x10] sm:$0xff]   ;;  %v1082_v22 = vld [vmem:[#allocation8 + $0x8] sm:$0xff]  }
  0x52   :  { %v1083_v23 = vld [vmem:[#allocation8] sm:$0xff]   ;;  %v914_v24 = vld [vmem:[%s1493_s3] ss:$0 sm:$0xff]  ;;  %v1086_v37 = vld [vmem:[#allocation10 + $0x74] ss:$8 sps:$4 sm:$0xff]  }
  0x53   :  { %1000 = vmatpush3.bf16.msra.mxu0 %v1067_v2  ;;  %v1084_v40 = vld [vmem:[#allocation10 + $0x70] ss:$8 sps:$4 sm:$0xff]   ;;  %v1089_v41 = vld [vmem:[#allocation10 + $0x64] ss:$8 sps:$4 sm:$0xff]   ;;  %v1087_v42 = vld [vmem:[#allocation10 + $0x60] ss:$8 sps:$4 sm:$0xff]  }
  0x54   :  { %1001 = vmatprep.subr.bf16.mxu0 %v1338_v0  ;;  %v1092_v43 = vld [vmem:[#allocation10 + $0x54] ss:$8 sps:$4 sm:$0xff]   ;;  %v1090_v44 = vld [vmem:[#allocation10 + $0x50] ss:$8 sps:$4 sm:$0xff]   ;;  %v1095_v45 = vld [vmem:[#allocation10 + $0x44] ss:$8 sps:$4 sm:$0xff]  }
  0x55   :  { %v1093_v46 = vld [vmem:[#allocation10 + $0x40] ss:$8 sps:$4 sm:$0xff]   ;;  %v1098_v47 = vld [vmem:[#allocation10 + $0x34] ss:$8 sps:$4 sm:$0xff]   ;;  %v1096_v48 = vld [vmem:[#allocation10 + $0x30] ss:$8 sps:$4 sm:$0xff]  }
  0x56   :  { %v1101_v49 = vld [vmem:[#allocation10 + $0x24] ss:$8 sps:$4 sm:$0xff]   ;;  %v1099_v50 = vld [vmem:[#allocation10 + $0x20] ss:$8 sps:$4 sm:$0xff]   ;;  %v1104_v51 = vld [vmem:[#allocation10 + $0x14] ss:$8 sps:$4 sm:$0xff]  }
  0x57   :  { %1002 = vmatpush3.bf16.msra.mxu0 %v1068_v3  ;;  %v1102_v52 = vld [vmem:[#allocation10 + $0x10] ss:$8 sps:$4 sm:$0xff]   ;;  %v1107_v53 = vld [vmem:[#allocation10 + $0x4] ss:$8 sps:$4 sm:$0xff]   ;;  %v1105_v54 = vld [vmem:[#allocation10] ss:$8 sps:$4 sm:$0xff]  }
  0x58   :  { %1003 = vmatprep.subr.bf16.mxu0 %v1338_v0  ;;  %v1108_v56 = vld [vmem:[#allocation11 + $0x70] ss:$8 sps:$4 sm:$0xff]   ;;  %v1110_v57 = vld [vmem:[#allocation11 + $0x74] ss:$8 sps:$4 sm:$0xff]   ;;  %v1113_v58 = vld [vmem:[#allocation11 + $0x64] ss:$8 sps:$4 sm:$0xff]  }
  0x59   :  { %v1111_v59 = vld [vmem:[#allocation11 + $0x60] ss:$8 sps:$4 sm:$0xff]   ;;  %v1116_v60 = vld [vmem:[#allocation11 + $0x54] ss:$8 sps:$4 sm:$0xff]   ;;  %v1114_v61 = vld [vmem:[#allocation11 + $0x50] ss:$8 sps:$4 sm:$0xff]  }
  0x5a   :  { %v1119_v62 = vld [vmem:[#allocation11 + $0x44] ss:$8 sps:$4 sm:$0xff]   ;;  %v1117_v63 = vld [vmem:[#allocation11 + $0x40] ss:$8 sps:$4 sm:$0xff]   ;;  %v1120_v1 = vld [vmem:[#allocation11 + $0x30] ss:$8 sps:$4 sm:$0xff]  }
  0x5b   :  { %1004 = vmatpush3.bf16.msra.mxu0 %v1069_v4  ;;  %v1125_v2 = vld [vmem:[#allocation11 + $0x24] ss:$8 sps:$4 sm:$0xff]   ;;  %v1123_v3 = vld [vmem:[#allocation11 + $0x20] ss:$8 sps:$4 sm:$0xff]   ;;  %v1128_v4 = vld [vmem:[#allocation11 + $0x14] ss:$8 sps:$4 sm:$0xff]  }
  0x5c   :  { %1005 = vmatprep.subr.bf16.mxu0 %v1338_v0 }
  0x5f   :  { %1006 = vmatpush3.bf16.msra.mxu0 %v1070_v5  ;;  %v1126_v5 = vld [vmem:[#allocation11 + $0x10] ss:$8 sps:$4 sm:$0xff]  }
  0x60   :  { %1007 = vmatprep.subr.bf16.mxu0 %v1338_v0 }
  0x63   :  { %1008 = vmatpush3.bf16.msra.mxu0 %v1071_v6  ;;  %v1131_v6 = vld [vmem:[#allocation11 + $0x4] ss:$8 sps:$4 sm:$0xff]  }
  0x64   :  { %1009 = vmatprep.subr.bf16.mxu0 %v1338_v0 }
  0x67   :  { %1010 = vmatpush3.bf16.msra.mxu0 %v1072_v7  ;;  %v1129_v7 = vld [vmem:[#allocation11] ss:$8 sps:$4 sm:$0xff]  }
  0x68   :  { %1011 = vmatprep.subr.bf16.mxu0 %v1338_v0 }
  0x6b   :  { %1012 = vmatpush3.bf16.msra.mxu0 %v1073_v8  ;;  %v1134_v8 = vld [vmem:[#allocation11 + $0xf4] ss:$8 sps:$4 sm:$0xff]  }
  0x6c   :  { %818 = vmatprep.subr.bf16.mxu0 %v1110_v57 }
  0x6e   :  { %1014 = vmatmul.mubr.bf16.vlgmr.msra.gmra.mxu0 %v1074_v9  ;;  %v1132_v9 = vld [vmem:[#allocation11 + $0xf0] ss:$8 sps:$4 sm:$0xff]  }
  0x6f   :  { %819 = vmatpush1.bf16.msra.mxu0 %v1108_v56 }
  0x70   :  { %820 = vmatprep.subr.bf16.mxu0 %v1113_v58 }
  0x73   :  { %821 = vmatpush1.bf16.msra.mxu0 %v1111_v59 }
  0x74   :  { %822 = vmatprep.subr.bf16.mxu0 %v1116_v60 }
  0x77   :  { %823 = vmatpush1.bf16.msra.mxu0 %v1114_v61 }
  0x78   :  { %824 = vmatprep.subr.bf16.mxu0 %v1119_v62 }
  0x7b   :  { %825 = vmatpush1.bf16.msra.mxu0 %v1117_v63 }
 0x12e   :  { %v231_v10 = vpop.f32.mrf.mxu0 }
 0x130   :  { %v1015_v11 = vpop.f32.mrf.mxu0 }
 0x131   :  { %v1135_v11 = vld [vmem:[#allocation11 + $0xe0] ss:$8 sps:$4 sm:$0xff]  }
 0x132   :  { %v234_v12 = vpop.f32.mrf.mxu0 }
 0x133   :  { %v238_v13 = vpack.c.bf16 %v234_v12, %v231_v10  ;;  %v1137_v10 = vld [vmem:[#allocation11 + $0xe4] ss:$8 sps:$4 sm:$0xff]   ;;  %v1140_v12 = vld [vmem:[#allocation11 + $0xd4] ss:$8 sps:$4 sm:$0xff]  }
 0x134   :  { %v1016_v14 = vpop.f32.mrf.mxu0 }
 0x135   :  { %1018 = vmatpush3.bf16.msra.mxu1 %v238_v13  ;;  %v1138_v13 = vld [vmem:[#allocation11 + $0xd0] ss:$8 sps:$4 sm:$0xff]   ;;  %v1143_v14 = vld [vmem:[#allocation11 + $0xc4] ss:$8 sps:$4 sm:$0xff]  }
 0x136   :  { %1023 = vmatprep.subr.bf16.mxu1 %v1338_v0 }
 0x138   :  { %1020 = vmatmul.mubr.msk.bf16.vlgmr.msra.gmra.mxu1 %vm250_vm1, %v1075_v15 }
 0x139   :  { %1024 = vmatpush3.bf16.msra.mxu1 %v1076_v16  ;;  %1039 = vmatprep.mubr.msk.bf16.mxu1 %vm1339_vm0, %v1338_v0  ;;  %v1146_v16 = vld [vmem:[#allocation11 + $0xb4] ss:$8 sps:$4 sm:$0xff]  }
 0x13a   :  { %1025 = vmatprep.subr.bf16.mxu1 %v1338_v0 }
 0x13d   :  { %1026 = vmatpush3.bf16.msra.mxu1 %v1077_v17  ;;  %v1144_v17 = vld [vmem:[#allocation11 + $0xb0] ss:$8 sps:$4 sm:$0xff]  }
 0x13e   :  { %1027 = vmatprep.subr.bf16.mxu1 %v1338_v0 }
 0x141   :  { %1028 = vmatpush3.bf16.msra.mxu1 %v1078_v18  ;;  %v925_v18 = vld [vmem:[%s1495_s5] ss:$0 sm:$0xff] }
 0x142   :  { %1029 = vmatprep.subr.bf16.mxu1 %v1338_v0 }
 0x145   :  { %1030 = vmatpush3.bf16.msra.mxu1 %v1079_v19 }
 0x146   :  { %1031 = vmatprep.subr.bf16.mxu1 %v1338_v0 }
 0x149   :  { %1032 = vmatpush3.bf16.msra.mxu1 %v1080_v20 }
 0x14a   :  { %1033 = vmatprep.subr.bf16.mxu1 %v1338_v0 }
 0x14d   :  { %1034 = vmatpush3.bf16.msra.mxu1 %v1081_v21 }
 0x14e   :  { %1035 = vmatprep.subr.bf16.mxu1 %v1338_v0 }
 0x151   :  { %1036 = vmatpush3.bf16.msra.mxu1 %v1082_v22 }
 0x152   :  { %1037 = vmatprep.subr.bf16.mxu1 %v1338_v0 }
 0x155   :  { %1038 = vmatpush3.bf16.msra.mxu1 %v1083_v23 }
 0x156   :  { %1043 = vmatprep.subr.bf16.mxu1 %v1338_v0 }
 0x1f8   :  { %v288_v25 = vpop.f32.mrf.mxu1 }
 0x1f9   :  { %v289_v27 = vadd.f32 %v914_v24, %v288_v25 }
 0x1fa   :  { %v1021_v26 = vpop.f32.mrf.mxu1 }
 0x1fb   :  { %v295_v31 = vmax.f32 %v289_v27, 0.0 }
 0x1fc   :  { %v291_v28 = vpop.f32.mrf.mxu1 }
 0x1fd   :  { %v292_v29 = vadd.f32 %v914_v24, %v291_v28  ;;  %v1149_v28 = vld [vmem:[#allocation11 + $0xa4] ss:$8 sps:$4 sm:$0xff]  }
 0x1fe   :  { %v1022_v30 = vpop.f32.mrf.mxu1 }
 0x1ff   :  { %v296_v32 = vmax.f32 %v292_v29, 0.0  ;;  %v1147_v29 = vld [vmem:[#allocation11 + $0xa0] ss:$8 sps:$4 sm:$0xff]   ;;  %v1152_v30 = vld [vmem:[#allocation11 + $0x94] ss:$8 sps:$4 sm:$0xff]  }
 0x201   :  { %v297_v33 = vpack.c.bf16 %v296_v32, %v295_v31  ;;  %v1150_v31 = vld [vmem:[#allocation11 + $0x90] ss:$8 sps:$4 sm:$0xff]   ;;  %v1155_v32 = vld [vmem:[#allocation11 + $0x84] ss:$8 sps:$4 sm:$0xff]  }
 0x203   :  { %1040 = vmatmul.mubr.bf16.vlgmr.msra.gmra.mxu1 %v297_v33  ;;  %v1153_v33 = vld [vmem:[#allocation11 + $0x80] ss:$8 sps:$4 sm:$0xff]  }
 0x204   :  { %1045 = vmatprep.mubr.msk.bf16.mxu1 %vm1339_vm0, %v1338_v0  ;;  %v1122_v0 = vld [vmem:[#allocation11 + $0x34] ss:$8 sps:$4 sm:$0xff]  }
 0x205   :  { %826 = vmatprep.subr.bf16.mxu0 %v1122_v0 }
 0x206   :  { %827 = vmatpush1.bf16.msra.mxu0 %v1120_v1 }
 0x207   :  { %828 = vmatprep.subr.bf16.mxu0 %v1125_v2 }
 0x20a   :  { %829 = vmatpush1.bf16.msra.mxu0 %v1123_v3 }
 0x20b   :  { %830 = vmatprep.subr.bf16.mxu0 %v1128_v4 }
 0x20e   :  { %831 = vmatpush1.bf16.msra.mxu0 %v1126_v5 }
 0x20f   :  { %832 = vmatprep.subr.bf16.mxu0 %v1131_v6 }
 0x212   :  { %833 = vmatpush1.bf16.msra.mxu0 %v1129_v7 }
 0x213   :  { %834 = vmatprep.subr.bf16.mxu0 %v1134_v8 }
 0x216   :  { %835 = vmatpush2.bf16.msra.mxu0 %v1132_v9 }
 0x217   :  { %836 = vmatprep.subr.bf16.mxu0 %v1137_v10 }
 0x21a   :  { %837 = vmatpush2.bf16.msra.mxu0 %v1135_v11 }
 0x21b   :  { %838 = vmatprep.subr.bf16.mxu0 %v1140_v12 }
 0x21e   :  { %839 = vmatpush2.bf16.msra.mxu0 %v1138_v13 }
 0x21f   :  { %840 = vmatprep.subr.bf16.mxu0 %v1143_v14 }
 0x2c3   :  { %v397_v34 = vpop.f32.mrf.mxu1 }
 0x2c5   :  { %v1041_v35 = vpop.f32.mrf.mxu1 }
 0x2c7   :  { %v400_v36 = vpop.f32.mrf.mxu1 }
 0x2c8   :  { %v404_v38 = vpack.c.bf16 %v400_v36, %v397_v34  ;;  %v475_v34 = vlaneseq }
 0x2c9   :  { %v1042_v39 = vpop.f32.mrf.mxu1 }
 0x2ca   :  { %1044 = vmatpush3.bf16.msra.mxu1 %v404_v38  ;;  %v476_v35 = vshrl.u32 %v475_v34, 7  ;;  %v473_v38 = vld [vmem:[%s1497_s7] sm:$0x3]  ;;  %s874_s7 = sshll.u32 %s1341_s30, 4  ;;  %s875_s7 = int_to_ptr.vmem [resolvable:$true] %s874_s7 }
 0x2cb   :  { %565 = vmatprep.subr.bf16.mxu1 %v1086_v37  ;;  %s1276_s12 = scalar_lea.vmem %s875_s7, 256  ;;  %p1281_p3 = scmp.lt.s32.totalorder %s875_s7, %s875_s7 }
 0x2cc   :  { %v481_v36 = vsub.s32 1, %v476_v35  ;;  %v477_v37 = vsub.s32 0, %v476_v35  ;;  %p1277_p2 = scmp.ne.s32.totalorder %s875_s7, %s1276_s12  ;;  %p1282_p4 = scmp.lt.s32.totalorder %s1276_s12, %s1276_s12 }
 0x2cd   :  { %1046 = vmatmul.mubr.msk.bf16.vlgmr.msra.gmra.mxu1 %vm250_vm1, %v1075_v15  ;;  %v1141_v15 = vld [vmem:[#allocation11 + $0xc0] ss:$8 sps:$4 sm:$0xff]  }
 0x2ce   :  { %566 = vmatpush1.bf16.msra.mxu1 %v1084_v40  ;;  %597 = vmatprep.mubr.bf16.mxu1 %v1340_v55  ;;  %v482_v40 = vrot.slane %v473_v38, %v481_v36  ;;  %p1283_p5 = por %p1282_p4, %p1281_p3 }
 0x2cf   :  { %567 = vmatprep.subr.bf16.mxu1 %v1089_v41  ;;  %841 = vmatpush2.bf16.msra.mxu0 %v1141_v15  ;;  %v478_v41 = vrot.slane %v473_v38, %v477_v37 }
 0x2d0   :  { %842 = vmatprep.subr.bf16.mxu0 %v1146_v16  ;;  %p1284_p6 = pnand %p1283_p5, %p1277_p2 }
 0x2d2   :  { %568 = vmatpush1.bf16.msra.mxu1 %v1087_v42 }
 0x2d3   :  { %569 = vmatprep.subr.bf16.mxu1 %v1092_v43  ;;  %843 = vmatpush2.bf16.msra.mxu0 %v1144_v17 }
 0x2d4   :  { %844 = vmatprep.subr.bf16.mxu0 %v1149_v28 }
 0x2d6   :  { %570 = vmatpush1.bf16.msra.mxu1 %v1090_v44 }
 0x2d7   :  { %571 = vmatprep.subr.bf16.mxu1 %v1095_v45  ;;  %845 = vmatpush2.bf16.msra.mxu0 %v1147_v29 }
 0x2d8   :  { %846 = vmatprep.subr.bf16.mxu0 %v1152_v30 }
 0x2da   :  { %572 = vmatpush1.bf16.msra.mxu1 %v1093_v46 }
 0x2db   :  { %573 = vmatprep.subr.bf16.mxu1 %v1098_v47  ;;  %847 = vmatpush2.bf16.msra.mxu0 %v1150_v31 }
 0x2dc   :  { %848 = vmatprep.subr.bf16.mxu0 %v1155_v32 }
 0x2de   :  { %574 = vmatpush1.bf16.msra.mxu1 %v1096_v48 }
 0x2df   :  { %575 = vmatprep.subr.bf16.mxu1 %v1101_v49  ;;  %849 = vmatpush2.bf16.msra.mxu0 %v1153_v33 }
 0x2e2   :  { %576 = vmatpush1.bf16.msra.mxu1 %v1099_v50 }
 0x2e3   :  { %577 = vmatprep.subr.bf16.mxu1 %v1104_v51 }
 0x2e6   :  { %578 = vmatpush1.bf16.msra.mxu1 %v1102_v52 }
 0x2e7   :  { %579 = vmatprep.subr.bf16.mxu1 %v1107_v53 }
 0x2ea   :  { %580 = vmatpush1.bf16.msra.mxu1 %v1105_v54 }
 0x38d   :  { %v445_v19 = vpop.f32.mrf.mxu1 }
 0x38e   :  { %v446_v20 = vadd.f32 %v925_v18, %v445_v19 }
 0x38f   :  { %v1047_v21 = vpop.f32.mrf.mxu1 }
 0x390   :  { %v452_v22 = vmax.f32 %v446_v20, 0.0 }
 0x391   :  { %v448_v23 = vpop.f32.mrf.mxu1 }
 0x392   :  { %454 = vst [vmem:[#allocation13] sm:$0xff] %v452_v22  ;;  %v449_v24 = vadd.f32 %v925_v18, %v448_v23 }
 0x393   :  { %v1048_v25 = vpop.f32.mrf.mxu1 }
 0x394   :  { %v453_v26 = vmax.f32 %v449_v24, 0.0 }
 0x396   :  { %455 = vst [vmem:[#allocation13 + $0x8] sm:$0xff] %v453_v26  ;;  %v456_v27 = vpack.c.bf16 %v453_v26, %v452_v22 }
 0x398   :  { %598 = vmatmul.mubr.bf16.vlgmr.msra.gmra.mxu1 %v456_v27 }
 0x458   :  { %v599_v39 = vpop.f32.mrf.mxu1 }
 0x459   :  { %v600_v46 = vadd.f32 %v599_v39, %v478_v41 }
 0x45a   :  { %v601_v42 = vpop.f32.mrf.mxu1 }
 0x45b   :  { %v602_v44 = vadd.f32 %v601_v42, %v482_v40  ;;  %v608_v52 = vmax.f32 %v600_v46, 0.0 }
 0x45c   :  { %v603_v43 = vpop.f32.mrf.mxu1 }
 0x45d   :  { %v604_v45 = vadd.f32 %v603_v43, %v478_v41  ;;  %v609_v50 = vmax.f32 %v602_v44, 0.0 }
 0x45e   :  { %v605_v47 = vpop.f32.mrf.mxu1 }
 0x45f   :  { %v606_v48 = vadd.f32 %v605_v47, %v482_v40  ;;  %v610_v49 = vmax.f32 %v604_v45, 0.0 }
 0x461   :  { %v611_v51 = vmax.f32 %v606_v48, 0.0  ;;  %v612_v54 = vpack.c.bf16 %v610_v49, %v608_v52 }
 0x463   :  { %v613_v53 = vpack.c.bf16 %v611_v51, %v609_v50 }
 0x465   :  { %850 = vmatprep.mubr.bf16.mxu0 %v613_v53 }
 0x466   :  { %851 = vmatmul.mubr.bf16.vlgmr.msra.gmra.mxu0 %v612_v54 }
 0x467   :  { %1287 = shalt.err (!%p1284_p6)
}
 0x468   :  { %880 = dma.vmem_to_hbm [thread:$0]  %s875_s7, 256, %s1500_s10, [#allocation4], %s1335_s0, %s1335_s0, %s1336_s21  }
 0x469   :  { %v646_v55 = vld [vmem:[%s1499_s9] sm:$0x3]  ;;  %s1342_s4 = smov [#allocation14]  }
 0x46a   :  { %v651_v56 = vrot.slane %v646_v55, %v477_v37  ;;  %v655_v57 = vrot.slane %v646_v55, %v481_v36  ;;  %s886_s16 = sshll.u32 %s1342_s4, 4  ;;  %s887_s16 = int_to_ptr.vmem [resolvable:$true] %s886_s16 }
 0x46b   :  { %s1296_s9 = scalar_lea.vmem %s887_s16, 512  ;;  %p1301_p8 = scmp.lt.s32.totalorder %s887_s16, %s887_s16 }
 0x46c   :  { %p1297_p7 = scmp.ne.s32.totalorder %s887_s16, %s1296_s9  ;;  %p1302_p9 = scmp.lt.s32.totalorder %s1296_s9, %s1296_s9 }
 0x46e   :  { %p1303_p10 = por %p1302_p9, %p1301_p8 }
 0x470   :  { %p1304_p11 = pnand %p1303_p10, %p1297_p7 }
 0x526   :  { %v852_v58 = vpop.f32.mrf.mxu0 }
 0x527   :  { %v853_v59 = vadd.f32 %v852_v58, %v651_v56 }
 0x528   :  { %v854_v60 = vpop.f32.mrf.mxu0 }
 0x529   :  { %v861_v61 = vmax.f32 %v853_v59, 0.0  ;;  %v855_v62 = vadd.f32 %v854_v60, %v655_v57 }
 0x52a   :  { %v856_v63 = vpop.f32.mrf.mxu0 }
 0x52b   :  { %865 = vst [vmem:[#allocation14] sm:$0xff] %v861_v61  ;;  %v862_v0 = vmax.f32 %v855_v62, 0.0  ;;  %v857_v1 = vadd.f32 %v856_v63, %v651_v56 }
 0x52c   :  { %v858_v2 = vpop.f32.mrf.mxu0 }
 0x52d   :  { %866 = vst [vmem:[#allocation14 + $0x8] sm:$0xff] %v862_v0  ;;  %v863_v3 = vmax.f32 %v857_v1, 0.0  ;;  %v859_v4 = vadd.f32 %v858_v2, %v655_v57 }
 0x52f   :  { %867 = vst [vmem:[#allocation14 + $0x10] sm:$0xff] %v863_v3  ;;  %v864_v5 = vmax.f32 %v859_v4, 0.0 }
 0x531   :  { %868 = vst [vmem:[#allocation14 + $0x18] sm:$0xff] %v864_v5 }
 0x532   :  { %1307 = shalt.err (!%p1304_p11)
}
 0x533   :  { %s1343_s10 = smov 256   ;;  %s1344_s17 = smov 16  }
 0x534   :  { %892 = dma.vmem_to_hbm [thread:$0]  %s887_s16, 512, %s1501_s11, [#allocation15], %s1343_s10, %s1343_s10, %s1344_s17  }
 0x535   :  { %1324 = dma.done.wait [#allocation4], 256  }
 0x536   :  { %1325 = vsyncadd [#allocation4], 4294967040 }
 0x537   :  { %1326 = dma.done.wait [#allocation15], 512  }
 0x538   :  { %1327 = vsyncadd [#allocation15], 4294966784 }
 0x539   :  { %899 = vsyncpa [#allocation3], 1 }
 0x53a   :  { %900 = vsyncpa [#allocation6], 1 }
 0x53b   :  { %901 = vsyncpa [#allocation9], 1 }
 0x53c   :  { %902 = vsyncpa [#allocation12], 1 }
 0x53d   :  { %903 = vsyncpa [#allocation4], 1 }
 0x53e   :  { %904 = vsyncpa [#allocation15], 1 }

</bundles_post_ra>
